<compile_context>
chip_gen: v5e
topology: v5e:2x2
jax: 0.10.0
libtpu: 0.0.40
codegen_flags: <defaults>
</compile_context>

<pallas_src>
import jax
import jax.numpy as jnp
from jax.experimental import pallas as pl
from jax.experimental.pallas import tpu as pltpu


def _dma_copy_kernel(x_hbm, o_hbm, sem):
    """Single HBM->HBM DMA; no VMEM staging, works for any shape / dtype."""
    copy = pltpu.make_async_copy(x_hbm, o_hbm, sem)
    copy.start()
    copy.wait()


def no_encoder(x, *args, **kwargs):
    """Pallas-side equivalent of NoEncoder.forward: returns x unchanged.

    Per the perf review, an identity should emit no kernel: zero HBM traffic,
    zero launch overhead.  Extra positional / keyword arguments (mask,
    lengths, ...) are accepted and ignored, exactly like the PyTorch forward.
    """
    del args, kwargs  # unused, as in the torch forward
    return x


def no_encoder_pallas(x, *args, **kwargs):
    """NoEncoder.forward behind an explicit Pallas kernel boundary.

    Only needed when a real kernel / fresh output buffer is required by the
    surrounding harness; otherwise prefer `no_encoder` (pure identity).
    The whole array is copied with one HBM->HBM DMA - no VMEM blocks, no
    tiling constraints, no shape fallback.
    """
    del args, kwargs  # unused, as in the torch forward
    if x.size == 0:
        return x
    return pl.pallas_call(
        _dma_copy_kernel,
        out_shape=jax.ShapeDtypeStruct(x.shape, x.dtype),
        in_specs=[pl.BlockSpec(memory_space=pl.ANY)],
        out_specs=pl.BlockSpec(memory_space=pl.ANY),
        scratch_shapes=[pltpu.SemaphoreType.DMA],
    )(x)


if __name__ == "__main__":
    # Shapes consistent with the module's usage: x = (batch, seq, hidden).
    B, L, C = 2, 8, 32

    key = jax.random.PRNGKey(0)
    kx, km = jax.random.split(key, 2)

    x = jax.random.normal(kx, (B, L, C), dtype=jnp.float32)
    mask = (jax.random.uniform(km, (B, L)) > 0.1).astype(jnp.float32)  # ignored

    # 1) Primary (zero-cost) path: identical semantics to the torch module.
    out = jax.block_until_ready(no_encoder(x, mask))
    assert out.shape == x.shape and out.dtype == x.dtype
    assert jnp.array_equal(out, x), "NoEncoder must return x unchanged"

    # 2) Kernel-boundary path: one HBM->HBM DMA, no VMEM staging.
    out_k = jax.block_until_ready(no_encoder_pallas(x, mask))
    assert out_k.shape == x.shape and out_k.dtype == x.dtype
    assert jnp.array_equal(out_k, x), "DMA identity mismatch"

    # 3) Odd, non-lane-multiple shape: no fallback logic needed anymore.
    x_odd = jax.random.normal(kx, (3, 5, 7), dtype=jnp.float32)
    out_odd = jax.block_until_ready(no_encoder_pallas(x_odd))
    assert jnp.array_equal(out_odd, x_odd), "odd-shape DMA identity mismatch"

    # 4) Packed dtype stays in its native dtype end to end.
    x_bf16 = x.astype(jnp.bfloat16)
    out_bf16 = jax.block_until_ready(no_encoder_pallas(x_bf16))
    assert out_bf16.dtype == jnp.bfloat16
    assert jnp.array_equal(out_bf16, x_bf16), "bf16 DMA identity mismatch"

    print("KERNEL_OK")
</pallas_src>

<mosaic_0001>
module attributes {stable_mosaic.version = 11 : i64} {
  func.func @_dma_copy_kernel(%arg0: memref<2x8x32xf32, #tpu.memory_space<any>>, %arg1: memref<2x8x32xf32, #tpu.memory_space<any>>, %arg2: memref<!tpu.dma_semaphore, #tpu.memory_space<semaphore_mem>>) attributes {dimension_semantics = [], scalar_prefetch = 0 : i64, scratch_operands = 1 : i64, tpu.core_type = #tpu.core_type<tc>} {
    tpu.enqueue_dma source(%arg0 : memref<2x8x32xf32, #tpu.memory_space<any>>) target(%arg1 : memref<2x8x32xf32, #tpu.memory_space<any>>) target_semaphore(%arg2 : memref<!tpu.dma_semaphore, #tpu.memory_space<semaphore_mem>>)
    tpu.wait_dma2 semaphore(%arg2 : memref<!tpu.dma_semaphore, #tpu.memory_space<semaphore_mem>>) src(%arg0 : memref<2x8x32xf32, #tpu.memory_space<any>>) dst(%arg1 : memref<2x8x32xf32, #tpu.memory_space<any>>)
    return
  }
}

</mosaic_0001>

<bundles_post_ra>
// kernel: tpu_custom_call.1
= control target key start
LH: loop header
LB: loop body
LE: loop exit
PB: predicated region body
PF: predicated region fallthrough
CT: control target
= control target key end

     0   :  { %s33_s12 = smov [#allocation2]   ;;  %s34_s13 = smov [#allocation3]   ;;  %s52_s0 = inlined_call_operand.hbm [shape: f32[2,8,32], index: 0, kind: input, shape index: {}]   ;;  %s53_s1 = inlined_call_operand.hbm [shape: f32[2,8,32], index: 1, kind: output, shape index: {}]  }
   0x1   :  { %s10_s8 = sshll.u32 %s52_s0, 4  ;;  %s12_s11 = sshll.u32 %s53_s1, 4  ;;  %s11_s8 = int_to_ptr.hbm [resolvable:$true] %s10_s8  ;;  %s13_s11 = int_to_ptr.hbm [resolvable:$true] %s12_s11 }
   0x2   :  { %s35_s14 = smov 0  }
   0x3   :  { %16 = dma.general %s11_s8, 256, %s13_s11, %s33_s12, %s34_s13, [#allocation4], %s35_s14, 0  }
   0x4   :  { %31 = dma.done.wait [#allocation2], 256 }
   0x5   :  { %32 = vsyncadd [#allocation2], 4294967040 }
   0x6   :  { %21 = vsyncmov [#allocation2] }
   0x9   :  { %s22_s15 = vpop.sfrf %21 }
   0xa   :  { %p27_p0 = scmp.ne.s32.totalorder %s22_s15, 0 }
   0xc   :  { %26 = shalt.err (%p27_p0)  }

</bundles_post_ra>
